<compile_context>
chip_gen: v5e
topology: v5e:2x2
jax: 0.10.0
libtpu: 0.0.40
codegen_flags: <defaults>
</compile_context>

<pallas_src>
import functools

import jax
import jax.numpy as jnp
from jax.experimental import pallas as pl
from jax.experimental.pallas import tpu as pltpu


# ---------------------------------------------------------------------------
# Kernels
# ---------------------------------------------------------------------------

def _mse_single_block_kernel(y_ref, t_ref, out_ref, *, inv_total):
    """Whole array resident in VMEM: one pass, one reduce, one scalar store."""
    d = y_ref[...].astype(jnp.float32) - t_ref[...].astype(jnp.float32)
    out_ref[...] = (jnp.sum(d * d) * inv_total).reshape(1, 1)


def _mse_tiled_kernel(y_ref, t_ref, out_ref):
    """Per-tile squared error (VPU) + one sublane reduce to a lane-dense row."""
    d = y_ref[...].astype(jnp.float32) - t_ref[...].astype(jnp.float32)
    sq = d * d
    # (row_block, lane_block) -> (1, lane_block) partial sum; lane-dense store.
    out_ref[...] = jnp.sum(sq, axis=0, keepdims=True).reshape(out_ref.shape)


# ---------------------------------------------------------------------------
# Wrapper
# ---------------------------------------------------------------------------

_SMALL_BYTES = 2 * 1024 * 1024  # per-input threshold for the single-block path


def _pick_block(dim, unit, max_block):
    """Largest multiple of `unit` that divides `dim` and is <= max_block."""
    best = unit
    b = unit
    cap = min(dim, max_block)
    while b <= cap:
        if dim % b == 0:
            best = b
        b += unit
    return best


def mse_loss_pallas(y, targets):
    """Mean squared error over all elements (matches torch.nn.MSELoss())."""
    assert y.shape == targets.shape, (y.shape, targets.shape)

    # Flatten to 2-D (rows, lanes); keep native dtype (upcast happens in-kernel).
    if y.ndim <= 1:
        y2 = y.reshape(1, -1)
        t2 = targets.reshape(1, -1)
    else:
        y2 = y.reshape(-1, y.shape[-1])
        t2 = targets.reshape(-1, targets.shape[-1])

    B, D = y2.shape
    total = B * D
    inv_total = 1.0 / float(total)
    in_bytes = total * y2.dtype.itemsize

    # ---- small path: one block covering the whole array --------------------
    if in_bytes <= _SMALL_BYTES:
        out = pl.pallas_call(
            functools.partial(_mse_single_block_kernel, inv_total=inv_total),
            out_shape=jax.ShapeDtypeStruct((1, 1), jnp.float32),
        )(y2, t2)
        return out[0, 0]

    # ---- streaming tiled path ----------------------------------------------
    # Pad (zeros contribute exactly 0 to the SSE) so tiles are (8,128)-aligned.
    if (B % 8) or (D % 128):
        pad_b = (-B) % 8
        pad_d = (-D) % 128
        y2 = jnp.pad(y2, ((0, pad_b), (0, pad_d)))
        t2 = jnp.pad(t2, ((0, pad_b), (0, pad_d)))
        B, D = y2.shape

    itemsize = y2.dtype.itemsize
    # Tile budget: 2 inputs x 2 pipeline buffers x tile <= ~16 MiB everywhere.
    max_lane = 2048 if itemsize <= 2 else 1024
    max_row = 1024 if itemsize <= 2 else 512
    lane_block = _pick_block(D, 128, max_lane)
    row_block = _pick_block(B, 8, max_row)

    rt = B // row_block
    ct = D // lane_block

    partials = pl.pallas_call(
        _mse_tiled_kernel,
        out_shape=jax.ShapeDtypeStruct((rt, 1, D), jnp.float32),
        grid_spec=pltpu.PrefetchScalarGridSpec(
            num_scalar_prefetch=0,
            grid=(rt, ct),
            in_specs=[
                pl.BlockSpec((row_block, lane_block), lambda i, j: (i, j)),
                pl.BlockSpec((row_block, lane_block), lambda i, j: (i, j)),
            ],
            out_specs=pl.BlockSpec((1, 1, lane_block), lambda i, j: (i, 0, j)),
        ),
        compiler_params=pltpu.CompilerParams(
            # Both axes are independent: lets v7x shard across its 2 TensorCores.
            dimension_semantics=("parallel", "parallel"),
            vmem_limit_bytes=32 * 1024 * 1024,
        ),
    )(y2, t2)

    # Tiny final reduction over per-tile partial sums (also improves accuracy
    # vs. a single serially-carried accumulator).
    return jnp.sum(partials) * inv_total


class Loss:
    """JAX/Pallas port of mlmisc.loss_wrappers.Loss."""

    def __init__(self, loss_fn):
        self.loss = loss_fn

    def __call__(self, y, targets):
        if targets is not None:
            return self.loss(y, targets)
        # targets is None -> PyTorch forward returns None implicitly
        return None


if __name__ == "__main__":
    key = jax.random.PRNGKey(0)
    ky, kt, ky2, kt2 = jax.random.split(key, 4)

    loss_mod = Loss(mse_loss_pallas)

    # Small shapes (single-block path), matching the module's generic usage.
    B, D = 8, 256
    y = jax.random.normal(ky, (B, D), dtype=jnp.float32)
    targets = jax.random.normal(kt, (B, D), dtype=jnp.float32)

    out = jax.block_until_ready(loss_mod(y, targets))
    ref = jnp.mean((y - targets) ** 2)
    assert jnp.allclose(out, ref, rtol=1e-5, atol=1e-6), (out, ref)

    # Exercise the streaming tiled path (still tiny, just above the threshold).
    B2, D2 = 1024, 640
    y_big = jax.random.normal(ky2, (B2, D2), dtype=jnp.float32)
    t_big = jax.random.normal(kt2, (B2, D2), dtype=jnp.float32)

    out_big = jax.block_until_ready(loss_mod(y_big, t_big))
    ref_big = jnp.mean((y_big - t_big) ** 2)
    assert jnp.allclose(out_big, ref_big, rtol=1e-5, atol=1e-6), (out_big, ref_big)

    # targets=None path returns None, matching the PyTorch module.
    assert loss_mod(y, None) is None

    print("KERNEL_OK")
</pallas_src>

<mosaic_0001>
module attributes {stable_mosaic.version = 11 : i64} {
  func.func @_mse_single_block_kernel(%arg0: memref<8x256xf32, #tpu.memory_space<vmem>>, %arg1: memref<8x256xf32, #tpu.memory_space<vmem>>, %arg2: memref<1x1xf32, #tpu.memory_space<vmem>>) attributes {dimension_semantics = [], scalar_prefetch = 0 : i64, scratch_operands = 0 : i64, tpu.core_type = #tpu.core_type<tc>} {
    %c0 = arith.constant 0 : index
    %c0_0 = arith.constant 0 : index
    %0 = vector.load %arg0[%c0, %c0_0] : memref<8x256xf32, #tpu.memory_space<vmem>>, vector<8x256xf32>
    %c0_1 = arith.constant 0 : index
    %c0_2 = arith.constant 0 : index
    %1 = vector.load %arg1[%c0_1, %c0_2] : memref<8x256xf32, #tpu.memory_space<vmem>>, vector<8x256xf32>
    %2 = arith.subf %0, %1 : vector<8x256xf32>
    %3 = arith.mulf %2, %2 : vector<8x256xf32>
    %4 = vector.shape_cast %3 : vector<8x256xf32> to vector<1x8x256xf32>
    %cst = arith.constant dense<0.000000e+00> : vector<1xf32>
    %5 = vector.multi_reduction <add>, %4, %cst [1, 2] : vector<1x8x256xf32> to vector<1xf32>
    %6 = vector.shape_cast %5 : vector<1xf32> to vector<1x1x1xf32>
    %7 = vector.extract %6[0, 0, 0] : f32 from vector<1x1x1xf32>
    %cst_3 = arith.constant 4.8828125E-4 : f32
    %8 = arith.mulf %7, %cst_3 : f32
    %9 = vector.broadcast %8 : f32 to vector<1x1xf32>
    %c0_4 = arith.constant 0 : index
    %c0_5 = arith.constant 0 : index
    %10 = vector.load %arg2[%c0_4, %c0_5] : memref<1x1xf32, #tpu.memory_space<vmem>>, vector<1x1xf32>
    tpu.vector_store %arg2[%c0_4, %c0_5], %9 {strides = array<i32>} : memref<1x1xf32, #tpu.memory_space<vmem>>, vector<1x1xf32>,
    return
  }
}

</mosaic_0001>

<bundles_post_ra>
// kernel: tpu_custom_call.1
= control target key start
LH: loop header
LB: loop body
LE: loop exit
PB: predicated region body
PF: predicated region fallthrough
CT: control target
= control target key end

     0   :  { %7 = vsyncpa [#allocation3], 0  ;;  %s190_s0 = inlined_call_operand.hbm [shape: f32[8,256], index: 0, kind: input, shape index: {}]   ;;  %s191_s1 = inlined_call_operand.hbm [shape: f32[8,256], index: 1, kind: input, shape index: {}]   ;;  %s192_s2 = inlined_call_operand.hbm [shape: f32[1,1], index: 2, kind: output, shape index: {}]  }
   0x1   :  { %8 = vsyncpa [#allocation6], 0 }
   0x2   :  { %9 = vsyncpa [#allocation4], 0  ;;  %s15_s11 = sshll.u32 %s190_s0, 4  ;;  %s163_s12 = smov [#allocation2]   ;;  %s16_s11 = int_to_ptr.hbm [resolvable:$true] %s15_s11 }
   0x3   :  { %s17_s13 = sshll.u32 %s163_s12, 4  ;;  %s26_s16 = sshll.u32 %s191_s1, 4  ;;  %s18_s13 = int_to_ptr.vmem [resolvable:$true] %s17_s13  ;;  %s27_s16 = int_to_ptr.hbm [resolvable:$true] %s26_s16 }
   0x4   :  { %20 = dma.hbm_to_vmem [thread:$0]  %s16_s11, 256, %s18_s13, [#allocation3]  }
   0x5   :  { %s164_s17 = smov [#allocation5]  }
   0x6   :  { %s28_s18 = sshll.u32 %s164_s17, 4  ;;  %s29_s18 = int_to_ptr.vmem [resolvable:$true] %s28_s18 }
   0x7   :  { %31 = dma.hbm_to_vmem [thread:$0]  %s27_s16, 256, %s29_s18, [#allocation6]  }
   0x8   :  { %157 = dma.done.wait [#allocation3], 256  }
   0x9   :  { %158 = vsyncadd [#allocation3], 4294967040 }
   0xa   :  { %159 = dma.done.wait [#allocation6], 256  }
   0xb   :  { %160 = vsyncadd [#allocation6], 4294967040  ;;  %v40_v0 = vld [vmem:[#allocation2] sm:$0xff]  ;;  %v41_v1 = vld [vmem:[#allocation2 + $0x8] sm:$0xff]  ;;  %s165_s0 = smov [#allocation7]   ;;  %s69_s21 = sshll.u32 %s192_s2, 4  ;;  %s70_s21 = int_to_ptr.hbm [resolvable:$true] %s69_s21 }
   0xc   :  { %v42_v2 = vld [vmem:[#allocation5] sm:$0xff]  ;;  %v43_v3 = vld [vmem:[#allocation5 + $0x8] sm:$0xff]  ;;  %s67_s1 = sshll.u32 %s165_s0, 4  ;;  %vm60_vm0 = vcmask 0   ;;  %s68_s1 = int_to_ptr.vmem [resolvable:$true] %s67_s1 }
   0xd   :  { %v44_v4 = vsub.f32 %v40_v0, %v42_v2  ;;  %v45_v5 = vsub.f32 %v41_v1, %v43_v3 }
   0xf   :  { %v46_v6 = vmul.f32 %v44_v4, %v44_v4  ;;  %v47_v7 = vmul.f32 %v45_v5, %v45_v5 }
  0x11   :  { %v48_v8 = vadd.f32 %v47_v7, %v46_v6 }
  0x13   :  { %49 = vadd.xlane.f32.xlu0 %v48_v8 }
  0x86   :  { %v50_v9 = vpop.xlane.xlu0 %49 }
  0x87   :  { %v51_v10 = vrot.slane %v50_v9, 4 }
  0x89   :  { %v52_v11 = vadd.f32 %v51_v10, %v50_v9 }
  0x8b   :  { %v53_v12 = vrot.slane %v52_v11, 2 }
  0x8d   :  { %v54_v13 = vadd.f32 %v53_v12, %v52_v11 }
  0x8f   :  { %v55_v14 = vrot.slane %v54_v13, 1 }
  0x91   :  { %v56_v15 = vadd.f32 %v55_v14, %v54_v13 }
  0x93   :  { %80 = vpush %v56_v15 }
  0xc4   :  { %s81_s22 = spop %80 }
  0xc5   :  { %s58_s23 = smul.f32 0.00048828125, %s81_s22 }
  0xc7   :  { %v59_v16 = vstv %s58_s23 }
  0xc8   :  { %61 = vst.msk [vmem:[#allocation7] sm:$0x1] %vm60_vm0, %v59_v16 }
  0xc9   :  { %72 = dma.vmem_to_hbm [thread:$0]  %s68_s1, 16, %s70_s21, [#allocation4]  }
  0xca   :  { %161 = dma.done.wait [#allocation4], 16  }
  0xcb   :  { %162 = vsyncadd [#allocation4], 4294967280 }
  0xcc   :  { %77 = vsyncpa [#allocation3], 1 }
  0xcd   :  { %78 = vsyncpa [#allocation6], 1 }
  0xce   :  { %79 = vsyncpa [#allocation4], 1 }

</bundles_post_ra>
